<compile_context>
chip_gen: v7x
topology: tpu7x:2x2x1
jax: 0.10.0
libtpu: 0.0.40
codegen_flags: <defaults>
</compile_context>

<pallas_src>
import math
from functools import partial

import jax
import jax.numpy as jnp
from jax import lax
from jax.experimental import pallas as pl
from jax.experimental.pallas import tpu as pltpu


# ----------------------------------------------------------------------------
# helpers
# ----------------------------------------------------------------------------
def _pick_tile(dim, target, align):
    """Largest tile <= target that divides `dim` and is `align`-aligned,
    falling back to the full dimension."""
    if dim <= target:
        return dim
    t = (target // align) * align
    while t >= align:
        if dim % t == 0:
            return t
        t -= align
    return dim


# ----------------------------------------------------------------------------
# Kernel 1: tiled fused linear (Conv1D):  y = x @ W + b
# ----------------------------------------------------------------------------
def _linear_kernel(x_ref, w_ref, b_ref, o_ref):
    acc = jnp.dot(x_ref[...], w_ref[...], preferred_element_type=jnp.float32)
    o_ref[...] = (acc + b_ref[...].astype(jnp.float32)).astype(o_ref.dtype)


def linear_pallas(x2d, w, b, *, tm_target=256, tn_target=256):
    # x2d: (N, K), w: (K, M), b: (M,).  K (= hidden size, <= 1600 for GPT-2)
    # stays VMEM-resident; N and M are tiled and both axes are "parallel".
    n, k = x2d.shape
    m = w.shape[1]
    tm = _pick_tile(n, tm_target, 8)
    tn = _pick_tile(m, tn_target, 128)
    grid = (n // tm, m // tn)
    itemsize = jnp.dtype(x2d.dtype).itemsize
    return pl.pallas_call(
        _linear_kernel,
        out_shape=jax.ShapeDtypeStruct((n, m), x2d.dtype),
        grid_spec=pltpu.PrefetchScalarGridSpec(
            num_scalar_prefetch=0,
            grid=grid,
            in_specs=[
                pl.BlockSpec((tm, k), lambda i, j: (i, 0)),
                pl.BlockSpec((k, tn), lambda i, j: (0, j)),
                pl.BlockSpec((1, tn), lambda i, j: (0, j)),
            ],
            out_specs=pl.BlockSpec((tm, tn), lambda i, j: (i, j)),
        ),
        compiler_params=pltpu.CompilerParams(
            dimension_semantics=("parallel", "parallel"),
        ),
        cost_estimate=pl.CostEstimate(
            flops=2 * n * m * k,
            transcendentals=0,
            bytes_accessed=(n * k + k * m + n * m + m) * itemsize,
        ),
    )(x2d, w, b.reshape(1, m))


# ----------------------------------------------------------------------------
# Kernel 2: flash-style causal attention reading directly from fused qkv
#   qkv layout: (B, S, 3E), columns [0,E)=q, [E,2E)=k, [2E,3E)=v,
#   each E split into H heads of width D.  `hpb` heads are processed per grid
#   step so the block width is hpb*D (>=128 lanes for GPT-2's D=64).
# ----------------------------------------------------------------------------
def _attn_kernel(q_ref, k_ref, v_ref, o_ref, m_sc, l_sc, acc_sc, *,
                 head_dim, hpb):
    qi = pl.program_id(2)
    ki = pl.program_id(3)
    nk = pl.num_programs(3)
    tq = q_ref.shape[1]
    tk = k_ref.shape[1]

    @pl.when(ki == 0)
    def _init():
        m_sc[...] = jnp.full_like(m_sc, -jnp.inf)
        l_sc[...] = jnp.zeros_like(l_sc)
        acc_sc[...] = jnp.zeros_like(acc_sc)

    # Causal tile skipping: a KV tile contributes only if its first key
    # position is <= the last query position of this q tile.
    @pl.when(ki * tk < (qi + 1) * tq)
    def _compute():
        scale = jnp.float32(1.0 / math.sqrt(head_dim))
        neg_big = jnp.float32(jnp.finfo(jnp.float32).min)

        # Mask computed once per (q-tile, kv-tile), shared across the heads.
        q_pos = qi * tq + lax.broadcasted_iota(jnp.int32, (tq, tk), 0)
        k_pos = ki * tk + lax.broadcasted_iota(jnp.int32, (tq, tk), 1)
        causal = k_pos <= q_pos

        qb = q_ref[0]      # (tq, hpb*D), stored dtype (bf16-friendly)
        kb = k_ref[0]      # (tk, hpb*D)
        vb = v_ref[0]      # (tk, hpb*D)

        for h in range(hpb):
            lo, hi = h * head_dim, (h + 1) * head_dim
            q_h = qb[:, lo:hi]
            k_h = kb[:, lo:hi]
            v_h = vb[:, lo:hi]

            # scores = q @ k^T / sqrt(D), f32 accumulation on the MXU
            s = lax.dot_general(
                q_h, k_h, (((1,), (1,)), ((), ())),
                preferred_element_type=jnp.float32) * scale
            s = jnp.where(causal, s, neg_big)

            m_prev = m_sc[h]                                   # (tq, 1)
            m_new = jnp.maximum(m_prev, jnp.max(s, axis=-1, keepdims=True))
            alpha = jnp.exp(m_prev - m_new)
            p = jnp.exp(s - m_new)                             # (tq, tk) f32
            l_sc[h] = alpha * l_sc[h] + jnp.sum(p, axis=-1, keepdims=True)
            acc_sc[h] = alpha * acc_sc[h] + lax.dot_general(
                p.astype(v_h.dtype), v_h, (((1,), (0,)), ((), ())),
                preferred_element_type=jnp.float32)
            m_sc[h] = m_new

    @pl.when(ki == nk - 1)
    def _finalize():
        outs = []
        for h in range(hpb):
            inv_l = pl.reciprocal(l_sc[h], approx=True)        # EUP slot
            outs.append(acc_sc[h] * inv_l)                     # (tq, D) f32
        # single lane-dense (tq, hpb*D) store
        o_ref[0] = jnp.concatenate(outs, axis=-1).astype(o_ref.dtype)


def attention_pallas(qkv, *, num_heads, head_dim, tq_target=128, tk_target=128):
    b, s, three_e = qkv.shape
    e = three_e // 3
    assert three_e == 3 * e and e == num_heads * head_dim

    # heads per block: aim for >=128-lane-wide blocks/stores
    if head_dim >= 128:
        hpb = 1
    else:
        hpb = min(num_heads, max(1, 128 // head_dim))
        while num_heads % hpb:
            hpb -= 1
    hg = num_heads // hpb
    bw = hpb * head_dim

    tq = _pick_tile(s, tq_target, 8)
    tk = _pick_tile(s, tk_target, 8)
    n_q, n_k = s // tq, s // tk

    kern = partial(_attn_kernel, head_dim=head_dim, hpb=hpb)

    # qkv column block offsets (in units of bw):  q -> g, k -> hg+g, v -> 2hg+g
    q_spec = pl.BlockSpec((1, tq, bw), lambda bi, g, qi, ki: (bi, qi, g))
    k_spec = pl.BlockSpec((1, tk, bw), lambda bi, g, qi, ki: (bi, ki, hg + g))
    v_spec = pl.BlockSpec((1, tk, bw), lambda bi, g, qi, ki: (bi, ki, 2 * hg + g))
    o_spec = pl.BlockSpec((1, tq, bw), lambda bi, g, qi, ki: (bi, qi, g))

    itemsize = jnp.dtype(qkv.dtype).itemsize
    return pl.pallas_call(
        kern,
        out_shape=jax.ShapeDtypeStruct((b, s, e), qkv.dtype),
        grid_spec=pltpu.PrefetchScalarGridSpec(
            num_scalar_prefetch=0,
            grid=(b, hg, n_q, n_k),
            in_specs=[q_spec, k_spec, v_spec],
            out_specs=o_spec,
            scratch_shapes=[
                pltpu.VMEM((hpb, tq, 1), jnp.float32),         # running max
                pltpu.VMEM((hpb, tq, 1), jnp.float32),         # running sum
                pltpu.VMEM((hpb, tq, head_dim), jnp.float32),  # output acc
            ],
        ),
        compiler_params=pltpu.CompilerParams(
            dimension_semantics=("parallel", "parallel", "parallel", "arbitrary"),
        ),
        cost_estimate=pl.CostEstimate(
            flops=4 * b * num_heads * s * s * head_dim,
            transcendentals=b * num_heads * s * s,
            bytes_accessed=(4 * b * s * e + b * n_q * 2 * s * e) * itemsize,
        ),
    )(qkv, qkv, qkv)


# ----------------------------------------------------------------------------
# GPT2Attention forward (wrapper; only free reshapes, no transposes)
# ----------------------------------------------------------------------------
def gpt2_attention_forward(hidden_states, params, num_heads):
    b, s, e = hidden_states.shape
    head_dim = e // num_heads

    x2d = hidden_states.reshape(b * s, e)

    # c_attn (Conv1D): (B*S, E) @ (E, 3E) + (3E,)
    qkv = linear_pallas(x2d, params["c_attn_w"], params["c_attn_b"])
    qkv = qkv.reshape(b, s, 3 * e)                 # free reshape, no transpose

    # fused causal multi-head attention, output already (B, S, E)
    attn_out = attention_pallas(qkv, num_heads=num_heads, head_dim=head_dim)

    # c_proj (Conv1D)
    out = linear_pallas(attn_out.reshape(b * s, e),
                        params["c_proj_w"], params["c_proj_b"])
    # attn_dropout / resid_dropout: identity (p = 0 / eval mode)
    return out.reshape(b, s, e)


# ----------------------------------------------------------------------------
# Pure-JAX reference for correctness check
# ----------------------------------------------------------------------------
def reference_forward(hidden_states, params, num_heads):
    b, s, e = hidden_states.shape
    d = e // num_heads
    qkv = hidden_states @ params["c_attn_w"] + params["c_attn_b"]
    q, k, v = jnp.split(qkv, 3, axis=-1)
    q = q.reshape(b, s, num_heads, d).transpose(0, 2, 1, 3)
    k = k.reshape(b, s, num_heads, d).transpose(0, 2, 1, 3)
    v = v.reshape(b, s, num_heads, d).transpose(0, 2, 1, 3)
    w = jnp.einsum("bhqd,bhkd->bhqk", q, k) / jnp.sqrt(jnp.float32(d))
    causal = jnp.tril(jnp.ones((s, s), dtype=bool))
    w = jnp.where(causal[None, None], w, jnp.finfo(jnp.float32).min)
    w = jax.nn.softmax(w, axis=-1)
    o = jnp.einsum("bhqk,bhkd->bhqd", w, v)
    o = o.transpose(0, 2, 1, 3).reshape(b, s, e)
    return o @ params["c_proj_w"] + params["c_proj_b"]


if __name__ == "__main__":
    # Small but TPU-tile-friendly config: batch=2, seq=256, hidden=256,
    # heads=4 -> head_dim=64 (GPT-2's real head_dim), 2 heads per block = 128
    # lanes, 128x128 flash tiles -> 2 q-tiles x 2 kv-tiles (one tile skipped
    # by the causal condition).
    B, S, E, H = 2, 256, 256, 4

    key = jax.random.PRNGKey(0)
    k_x, k_w1, k_w2, k_b1, k_b2 = jax.random.split(key, 5)

    params = {
        "c_attn_w": 0.02 * jax.random.normal(k_w1, (E, 3 * E), dtype=jnp.float32),
        "c_attn_b": 0.02 * jax.random.normal(k_b1, (3 * E,), dtype=jnp.float32),
        "c_proj_w": 0.02 * jax.random.normal(k_w2, (E, E), dtype=jnp.float32),
        "c_proj_b": 0.02 * jax.random.normal(k_b2, (E,), dtype=jnp.float32),
    }

    x = jax.random.normal(k_x, (B, S, E), dtype=jnp.float32)

    out = gpt2_attention_forward(x, params, num_heads=H)
    out = jax.block_until_ready(out)

    ref = reference_forward(x, params, num_heads=H)
    assert out.shape == (B, S, E)
    max_err = float(jnp.max(jnp.abs(out - ref)))
    # approx reciprocal (EUP) in the softmax denominator -> slightly looser tol
    assert jnp.allclose(out, ref, atol=2e-3, rtol=2e-3), (
        f"mismatch vs reference, max abs err {max_err}")

    print("KERNEL_OK")
</pallas_src>

<mosaic_0001>
module attributes {stable_mosaic.version = 11 : i64} {
  func.func @_linear_kernel(%arg0: i32, %arg1: i32, %arg2: memref<256x256xf32, #tpu.memory_space<vmem>>, %arg3: memref<256x256xf32, #tpu.memory_space<vmem>>, %arg4: memref<1x256xf32, #tpu.memory_space<vmem>>, %arg5: memref<256x256xf32, #tpu.memory_space<vmem>>) attributes {dimension_semantics = [#tpu.dimension_semantics<parallel>, #tpu.dimension_semantics<parallel>], iteration_bounds = array<i64: 2, 3>, scalar_prefetch = 0 : i64, scratch_operands = 0 : i64, tpu.core_type = #tpu.core_type<tc>, window_params = [{transform_indices = @transform_0, window_bounds = array<i64: 256, 256>}, {transform_indices = @transform_1, window_bounds = array<i64: 256, 256>}, {transform_indices = @transform_2, window_bounds = array<i64: 1, 256>}, {transform_indices = @transform_3, window_bounds = array<i64: 256, 256>}]} {
    %c0 = arith.constant 0 : index
    %c0_0 = arith.constant 0 : index
    %0 = vector.load %arg2[%c0, %c0_0] : memref<256x256xf32, #tpu.memory_space<vmem>>, vector<256x256xf32>
    %c0_1 = arith.constant 0 : index
    %c0_2 = arith.constant 0 : index
    %1 = vector.load %arg3[%c0_1, %c0_2] : memref<256x256xf32, #tpu.memory_space<vmem>>, vector<256x256xf32>
    %cst = arith.constant dense<0.000000e+00> : vector<256x256xf32>
    %2 = tpu.matmul %0, %1, %cst {dimension_numbers = #tpu.dot_dimension_numbers<[1], [0], [0], [1], [0, 0, 1, 1], [], []>} : vector<256x256xf32>, vector<256x256xf32>, vector<256x256xf32> -> vector<256x256xf32>
    %c0_3 = arith.constant 0 : index
    %c0_4 = arith.constant 0 : index
    %3 = vector.load %arg4[%c0_3, %c0_4] : memref<1x256xf32, #tpu.memory_space<vmem>>, vector<1x256xf32>
    %4 = vector.broadcast %3 : vector<1x256xf32> to vector<256x256xf32>
    %5 = arith.addf %2, %4 : vector<256x256xf32>
    %c0_5 = arith.constant 0 : index
    %c0_6 = arith.constant 0 : index
    %6 = vector.load %arg5[%c0_5, %c0_6] : memref<256x256xf32, #tpu.memory_space<vmem>>, vector<256x256xf32>
    tpu.vector_store %arg5[%c0_5, %c0_6], %5 {strides = array<i32>} : memref<256x256xf32, #tpu.memory_space<vmem>>, vector<256x256xf32>,
    return
  }
  func.func @transform_0(%arg0: i32, %arg1: i32) -> (i32, i32) {
    %c0_i32 = arith.constant 0 : i32
    %c0_i32_0 = arith.constant 0 : i32
    return %arg0, %c0_i32 : i32, i32
  }
  func.func @transform_1(%arg0: i32, %arg1: i32) -> (i32, i32) {
    %c0_i32 = arith.constant 0 : i32
    %c0_i32_0 = arith.constant 0 : i32
    return %c0_i32, %arg1 : i32, i32
  }
  func.func @transform_2(%arg0: i32, %arg1: i32) -> (i32, i32) {
    %c0_i32 = arith.constant 0 : i32
    %c0_i32_0 = arith.constant 0 : i32
    return %c0_i32, %arg1 : i32, i32
  }
  func.func @transform_3(%arg0: i32, %arg1: i32) -> (i32, i32) {
    %c0_i32 = arith.constant 0 : i32
    return %arg0, %arg1 : i32, i32
  }
}

</mosaic_0001>

<bundles_post_ra>
// kernel: tpu_custom_call.1
= control target key start
LH: loop header
LB: loop body
LE: loop exit
PB: predicated region body
PF: predicated region fallthrough
CT: control target
= control target key end

     0   :  { %s2096_s0 = inlined_call_operand.hbm [shape: f32[512,256], index: 0, kind: input, shape index: {}]   ;;  %s2097_s1 = inlined_call_operand.hbm [shape: f32[256,768], index: 1, kind: input, shape index: {}]   ;;  %s2098_s2 = inlined_call_operand.hbm [shape: f32[1,768], index: 2, kind: input, shape index: {}]   ;;  %s2099_s3 = inlined_call_operand.hbm [shape: f32[512,768], index: 3, kind: output, shape index: {}]  }
   0x1   :  { %2117 = sst [smem:[#allocation24_spill]] %s2097_s1 }
   0x2   :  { %2118 = sst [smem:[#allocation25_spill]] %s2099_s3 }
   0x3   :  { %8 = vsyncpa [#allocation3], 0 }
   0x4   :  { %10 = vsyncpa [#allocation3 + $0x1], 0 }
   0x5   :  { %11 = vsyncpa [#allocation6], 0 }
   0x6   :  { %13 = vsyncpa [#allocation6 + $0x1], 0 }
   0x7   :  { %14 = vsyncpa [#allocation4], 0 }
   0x8   :  { %16 = vsyncpa [#allocation4 + $0x1], 0  ;;  %s1433_s12 = smov 0   ;;  %s1435_s13 = smov 0  }
   0x9   :  { %s1437_s14 = smov 0   ;;  %s1439_s15 = smov 0  }
   0xa   :  { %s1441_s16 = smov 0   ;;  %s1443_s17 = smov 0  }
   0xb   :  { %s1445_s18 = smov 0   ;;  %s1447_s19 = smov 0  }
   0xc   :  { %s1449_s20 = smov 0   ;;  %s1451_s21 = smov 0  }
   0xd   :  { %s1453_s22 = smov 0   ;;  %s1455_s23 = smov 0  }
   0xe   :  { %s1457_s24 = smov 0   ;;  %s1459_s25 = smov 0  }
   0xf LB: > { %2119 = sst [smem:[#allocation12_spill]] %s1357_s14  ;;  %s31_s26 = sadd.s32 1, %s1393_s23  ;;  %s1401_s25 = sphi %s1459_s25, %s22_s25   ;;  %s1397_s24 = sphi %s1457_s24, %s2170_s24   ;;  %s1393_s23 = sphi %s1455_s23, %s2178_s23   ;;  %s1389_s22 = sphi %s1453_s22, %s2168_s22   ;;  %s1385_s21 = sphi %s1451_s21, %s2177_s21   ;;  %s1381_s20 = sphi %s1449_s20, %s2166_s20   ;;  %s1377_s19 = sphi %s1447_s19, %s2176_s19   ;;  %s1373_s18 = sphi %s1445_s18, %s2175_s18   ;;  %s1369_s17 = sphi %s1443_s17, %s2164_s17   ;;  %s1365_s16 = sphi %s1441_s16, %s2174_s16   ;;  %s1361_s15 = sphi %s1439_s15, %s2173_s15   ;;  %s1357_s14 = sphi %s1437_s14, %s2162_s14   ;;  %s1353_s13 = sphi %s1435_s13, %s2172_s13   ;;  %s1349_s12 = sphi %s1433_s12, %s2171_s12  }
  0x10   : > { %2120 = sst [smem:[#allocation13_spill]] %s1369_s17  ;;  %p2102_p0 = scmp.eq.s32.totalorder %s1401_s25, 0 }
  0x11   : > { %2121 = sst [smem:[#allocation14_spill]] %s1381_s20  ;;  %p1507_p1 = scmp.ge.s32.totalorder %s31_s26, 3 }
  0x12   : > { %2122 = sst [smem:[#allocation15_spill]] %s1385_s21  ;;  %p74_p2 = scmp.ne.s32.totalorder %s1369_s17, %s1365_s16 }
  0x13   : > { %2123 = sst [smem:[#allocation16_spill]] %s1389_s22  ;;  %p2101_p4 = scmp.lt.s32.totalorder %s1401_s25, 6 }
  0x14   : > { %2124 = sst [smem:[#allocation17_spill]] %s1393_s23  ;;  %p76_p5 = por %p74_p2, %p2102_p0 }
  0x15   : > { %2125 = sst [smem:[#allocation18_spill]] %s1397_s24  ;;  %s180_s29 = sand.u32 1, %s1401_s25  }
  0x16   : > { %s2100_s30 = sand.u32 1, %s1369_s17   ;;  %s920_s5 = sshll.u32 %s1393_s23, 8 }
  0x17   : > { %s900_s4 = sshll.u32 %s2100_s30, 9  ;;  %s2127_s1 = sld [smem:[#allocation24_spill]] }
  0x18   : > { %s184_s9 = scalar_lea.vmem [#allocation5], %s900_s4  ;;  %p1531_p6 = pnand %p2101_p4, %p76_p5 }
  0x19   : > { %s191_s10 = sshll.u32 %s184_s9, 4  ;;  %s1538_s30 = scalar_lea.sflag [#allocation6], %s180_s29  ;;  %s1535_s10 = int_to_ptr.vmem [resolvable:$true] %s191_s10 }
  0x1a   : > { %p2113_p9 = pneg %p1531_p6 }
  0x1d   : > { %s1527_s8 = scalar_lea.hbm %s2127_s1, %s920_s5  ;;  %s1166_s7 = scalar_lea.hbm %s2127_s1, 24576 }
  0x1e   : > { %s1161_s5 = scalar_lea.hbm %s1527_s8, 8192  ;;  %p1167_p12 = scmp.lt.u32.totalorder %s1527_s8, %s2127_s1 }
  0x1f   : > { %p1162_p8 = scmp.ne.s32.totalorder %s1527_s8, %s1161_s5  ;;  %p1168_p13 = scmp.lt.u32.totalorder %s1166_s7, %s1161_s5 }
  0x20   : > { %p1170_p5 = scmp.lt.u32.totalorder %s1161_s5, %s1527_s8 }
  0x21   : > { %p1164_p10 = pnand %p2113_p9, %p1162_p8  ;;  %p1169_p2 = por %p1168_p13, %p1167_p12 }
  0x23   : > { %p1165_p11 = pneg %p1164_p10  ;;  %p1171_p4 = por %p1170_p5, %p1169_p2 }
  0x25   : > { %p1172_p3 = pnand %p1171_p4, %p1165_p11 }
  0x27   : > { %1175 = shalt.err (!%p1172_p3)
}
  0x28   : > { %s1176_s29 = scalar_lea.vmem %s1535_s10, 8192  ;;  %s1403_s4 = smov [#allocation5]  }
  0x29   : > { %p1177_p8 = scmp.ne.s32.totalorder %s1535_s10, %s1176_s29  ;;  %s1181_s6 = sshll.u32 %s1403_s4, 4  ;;  %s1182_s6 = int_to_ptr.vmem [resolvable:$false] %s1181_s6 }
  0x2a   : > { %s1183_s28 = scalar_lea.vmem %s1182_s6, 16384  ;;  %p1184_p7 = scmp.lt.s32.totalorder %s1535_s10, %s1182_s6 }
  0x2b   : > { %p1179_p10 = pnand %p1177_p8, %p2113_p9  ;;  %p1185_p12 = scmp.lt.s32.totalorder %s1183_s28, %s1176_s29 }
  0x2d   : > { %p1180_p0 = pneg %p1179_p10  ;;  %p1186_p13 = por %p1185_p12, %p1184_p7 }
  0x2f   : > { %p1187_p2 = pnand %p1186_p13, %p1180_p0 }
  0x31   : > { %1190 = shalt.err (!%p1187_p2)
}
  0x32   : > { %s1404_s5 = smov 768   ;;  %s2103_s7 = smov 256  }
  0x33   : > { %s2104_s9 = smov 16   ;;  %p218_p0 = scmp.lt.s32.totalorder %s1401_s25, 7 }
  0x34   : > { %1033 = dma.hbm_to_vmem [thread:$0]  (!%p1531_p6), %s1527_s8, 8192, %s1535_s10, %s1538_s30, %s1404_s5, %s2103_s7, %s2104_s9  }
  0x35   : > { %p2129_p3 = scmp.ge.s32.totalorder %s1401_s25, 1  ;;  %s1576_s4 = sadd.s32 4294967295, %s1401_s25  }
  0x36   : > { %s893_s6 = sadd.s32 4294967294, %s1401_s25   ;;  %s2180_s26 = smov (%p1507_p1, %s31_s26), 0 }
  0x37   : > { %p1571_p4 = pnand %p2129_p3, %p218_p0  ;;  %2131 = sst [smem:[#allocation19_spill]] %s2180_s26 }
  0x38   : > { %s34_s28 = sadd.s32 1, %s1397_s24  ;;  %s41_s8 = sadd.s32 1, %s1381_s20 }
  0x39   : > { %s2130_s29 = scalar_select %p1571_p4, 1, 0 }
  0x3a   : > { %s2182_s28 = smov (!%p1507_p1, %s34_s28), %s1397_s24  ;;  %p48_p7 = scmp.ne.s32.totalorder %s1381_s20, %s1377_s19 }
  0x3b   : > { %p54_p11 = scmp.ne.s32.totalorder %s1377_s19, %s1373_s18  ;;  %p36_p5 = scmp.ge.s32.totalorder %s2182_s28, 2 }
  0x3c   : > { %p55_p8 = scmp.eq.s32.totalorder %s1576_s4, 0  ;;  %p2132_p10 = scmp.eq.s32.totalorder %s1401_s25, 0 }
  0x3d   : > { %s64_s5 = ssub.s32 %s1393_s23, %s2180_s26  ;;  %s2184_s28 = smov (%p36_p5, %s2182_s28), 0 }
  0x3e   : > { %p1597_p12 = por %p2132_p10, %p48_p7  ;;  %2134 = sst [smem:[#allocation20_spill]] %s2184_s28 }
  0x3f   : > { %p1605_p1 = por %p55_p8, %p54_p11  ;;  %p65_p13 = scmp.eq.s32.totalorder %s64_s5, 0 }
  0x40   : > { %s38_s18 = ssub.s32 %s1397_s24, %s2184_s28  ;;  %p2136_p2 = scmp.ne.s32.totalorder %s1365_s16, %s1361_s15 }
  0x41   : > { %s2135_s27 = scalar_select %p1605_p1, 1, 0 }
  0x42   : > { %p1614_p0 = por %p2136_p2, %p55_p8  ;;  %p39_p3 = scmp.eq.s32.totalorder %s38_s18, 0 }
  0x43   : > { %s118_s9 = sor.u32 %s64_s5, %s38_s18  ;;  %s2138_s1 = sadd.s32 1, %s1369_s17 }
  0x44   : > { %s2137_s7 = scalar_select %p1614_p0, 1, 0 }
  0x45   : > { %s1621_s26 = scalar_select %p65_p13, %s1369_s17, %s2138_s1  }
  0x46   : > { %s1624_s3 = scalar_select %p39_p3, %s1381_s20, %s41_s8  }
  0x47   : > { %2139 = sst [smem:[#allocation21_spill]] %s1621_s26  ;;  %p119_p7 = scmp.eq.s32.totalorder %s118_s9, 0 }
  0x48   : > { %2140 = sst [smem:[#allocation22_spill]] %s1624_s3  ;;  %s121_s21 = sadd.s32 1, %s1357_s14 }
  0x49   : > { %p131_p11 = scmp.ne.s32.totalorder %s1357_s14, %s1353_s13  ;;  %p132_p5 = scmp.eq.s32.totalorder %s1576_s4, 5 }
  0x4a   : > { %s1631_s15 = scalar_select %p119_p7, %s1357_s14, %s121_s21  }
  0x4b   : > { %p1633_p8 = por %p132_p5, %p131_p11  ;;  %p137_p10 = scmp.ne.s32.totalorder %s1353_s13, %s1349_s12 }
  0x4c   : > { %2141 = sst [smem:[#allocation23_spill]] %s1631_s15  ;;  %p138_p2 = scmp.eq.s32.totalorder %s893_s6, 5 }
  0x4d   : > { %s2142_s28 = scalar_select %p1633_p8, 1, 0 }
  0x4e   : > { %s158_s1 = sand.u32 1, %s1381_s20   ;;  %p1640_p13 = por %p138_p2, %p137_p10 }
  0x4f   : > { %s896_s5 = sshll.u32 %s158_s1, 9  ;;  %s919_s9 = sshll.u32 %s1397_s24, 13 }
  0x50   : > { %s2143_s8 = scalar_select %p1640_p13, 1, 0 }
  0x51   : > { %s162_s18 = scalar_lea.vmem [#allocation2], %s896_s5  ;;  %s1648_s21 = scalar_lea.hbm %s2096_s0, %s919_s9 }
  0x52   : > { %s170_s3 = sshll.u32 %s162_s18, 4  ;;  %p2144_p3 = scmp.lt.s32.totalorder %s1401_s25, 6  ;;  %s1650_s3 = int_to_ptr.vmem [resolvable:$true] %s170_s3 }
  0x53   : > { %s2146_s24 = sand.u32 1, %s1369_s17   ;;  %s921_s22 = sshll.u32 %s1393_s23, 5 }
  0x54   : > { %p1656_p7 = pnand %p2144_p3, %p1597_p12  ;;  %s1662_s5 = sshll.u32 %s2146_s24, 1 }
  0x55   : > { %s1668_s18 = scalar_lea.hbm %s2098_s2, %s921_s22  ;;  %s1670_s20 = scalar_lea.sflag [#allocation3], %s158_s1 }
  0x56   : > { %s1191_s15 = scalar_lea.hbm %s1648_s21, 8192  ;;  %p1193_p12 = pneg %p1656_p7 }
  0x57   : > { %p1192_p11 = scmp.ne.s32.totalorder %s1648_s21, %s1191_s15  ;;  %s1196_s24 = scalar_lea.hbm %s2096_s0, 16384 }
  0x58   : > { %p1197_p2 = scmp.lt.u32.totalorder %s1648_s21, %s2096_s0  ;;  %p1198_p3 = scmp.lt.u32.totalorder %s1196_s24, %s1191_s15 }
  0x59   : > { %p1194_p5 = pnand %p1193_p12, %p1192_p11  ;;  %p1200_p13 = scmp.lt.u32.totalorder %s1191_s15, %s1648_s21 }
  0x5a   : > { %p1199_p9 = por %p1198_p3, %p1197_p2 }
  0x5b   : > { %p1195_p10 = pneg %p1194_p5 }
  0x5c   : > { %p1201_p8 = por %p1200_p13, %p1199_p9 }
  0x5e   : > { %p1202_p0 = pnand %p1201_p8, %p1195_p10 }
  0x60   : > { %1205 = shalt.err (!%p1202_p0)
}
  0x61   : > { %s1206_s1 = scalar_lea.vmem %s1650_s3, 8192  ;;  %s1407_s17 = smov [#allocation2]  }
  0x62   : > { %p1207_p11 = scmp.ne.s32.totalorder %s1650_s3, %s1206_s1  ;;  %s1211_s22 = sshll.u32 %s1407_s17, 4  ;;  %s1212_s22 = int_to_ptr.vmem [resolvable:$false] %s1211_s22 }
  0x63   : > { %s1213_s14 = scalar_lea.vmem %s1212_s22, 16384  ;;  %p1214_p4 = scmp.lt.s32.totalorder %s1650_s3, %s1212_s22 }
  0x64   : > { %p1209_p5 = pnand %p1207_p11, %p1193_p12  ;;  %p1215_p2 = scmp.lt.s32.totalorder %s1213_s14, %s1206_s1 }
  0x66   : > { %p1210_p1 = pneg %p1209_p5  ;;  %p1216_p3 = por %p1215_p2, %p1214_p4 }
  0x68   : > { %p1217_p9 = pnand %p1216_p3, %p1210_p1 }
  0x6a   : > { %1220 = shalt.err (!%p1217_p9)
}
  0x6b   : > { %s2147_s23 = smov 16   ;;  %s2148_s15 = smov 256  }
  0x6c   : > { %1030 = dma.hbm_to_vmem [thread:$0]  (!%p1656_p7), %s1648_s21, 8192, %s1650_s3, %s1670_s20, %s2148_s15, %s2148_s15, %s2147_s23  }
  0x6d   : > { %s205_s26 = scalar_lea.vmem [#allocation7], %s1662_s5  ;;  %s1221_s10 = scalar_lea.hbm %s1668_s18, 32 }
  0x6e   : > { %s213_s9 = sshll.u32 %s205_s26, 4  ;;  %p1222_p4 = scmp.ne.s32.totalorder %s1668_s18, %s1221_s10  ;;  %s214_s9 = int_to_ptr.vmem [resolvable:$true] %s213_s9 }
  0x6f   : > { %p2149_p1 = pneg %p1531_p6  ;;  %s1226_s1 = scalar_lea.hbm %s2098_s2, 96 }
  0x70   : > { %p1227_p13 = scmp.lt.u32.totalorder %s1668_s18, %s2098_s2  ;;  %p1228_p12 = scmp.lt.u32.totalorder %s1226_s1, %s1221_s10 }
  0x71   : > { %p1224_p0 = pnand %p1222_p4, %p2149_p1  ;;  %p1230_p7 = scmp.lt.u32.totalorder %s1221_s10, %s1668_s18 }
  0x72   : > { %p1229_p10 = por %p1228_p12, %p1227_p13 }
  0x73   : > { %p1225_p8 = pneg %p1224_p0 }
  0x74   : > { %p1231_p11 = por %p1230_p7, %p1229_p10 }
  0x76   : > { %p1232_p5 = pnand %p1231_p11, %p1225_p8 }
  0x78   : > { %1235 = shalt.err (!%p1232_p5)
}
  0x79   : > { %s1236_s3 = scalar_lea.vmem %s214_s9, 32  ;;  %p2150_p3 = pmov %p2149_p1 }
  0x7a   : > { %p1237_p2 = scmp.ne.s32.totalorder %s214_s9, %s1236_s3  ;;  %s1408_s20 = smov [#allocation7]  }
  0x7b   : > { %s1241_s21 = sshll.u32 %s1408_s20, 4  ;;  %s1242_s21 = int_to_ptr.vmem [resolvable:$false] %s1241_s21 }
  0x7c   : > { %p1239_p9 = pnand %p1237_p2, %p2150_p3  ;;  %s1243_s5 = scalar_lea.vmem %s1242_s21, 64 }
  0x7d   : > { %p1244_p1 = scmp.lt.s32.totalorder %s214_s9, %s1242_s21  ;;  %p1245_p0 = scmp.lt.s32.totalorder %s1243_s5, %s1236_s3 }
  0x7e   : > { %p1240_p4 = pneg %p1239_p9 }
  0x7f   : > { %p1246_p12 = por %p1245_p0, %p1244_p1 }
  0x81   : > { %p1247_p13 = pnand %p1246_p12, %p1240_p4 }
  0x83   : > { %1250 = shalt.err (!%p1247_p13)
}
  0x84   : > { %1036 = dma.hbm_to_vmem [thread:$0]  (!%p1531_p6), %s1668_s18, 32, %s214_s9, %s1538_s30  }
  0x85   : > { %p2151_p8 = scmp.ne.s32.totalorder %s2130_s29, 0 }
  0x86   : > { %s224_s14 = sand.u32 (!%p2151_p8), 1, %s1377_s19   ;;  %p2152_p10 = scmp.ne.s32.totalorder (!%p2151_p8), %s2135_s27, 0 }
  0x87   : > { %222 = sbr.rel (%p2151_p8) target bundleno = 506 (0x1fa), region = 32  ;;  %s907_s23 = sshll.u32 (!%p2151_p8), %s224_s14, 9 }
  0x88   : > { %s225_s15 = scalar_lea.sflag (!%p2151_p8), [#allocation3], %s224_s14  ;;  %s1725_s26 = scalar_lea.vmem (!%p2151_p8), [#allocation2], %s907_s23 }
  0x8e   : > { %1336 = dma.done.wait (%p2152_p10), %s225_s15, 8192  }
  0x8f   : > { %1338 = vsyncadd (%p2152_p10), %s225_s15, 4294959104  ;;  %s233_s30 = sand.u32 1, %s1576_s4   ;;  %s235_s11 = sand.u32 1, %s1365_s16  }
  0x90   : > { %s908_s29 = sshll.u32 %s235_s11, 9  ;;  %s234_s18 = scalar_lea.sflag [#allocation6], %s233_s30 }
  0x91   : > { %s1735_s9 = scalar_lea.vmem [#allocation5], %s908_s29  ;;  %p2153_p6 = scmp.ne.s32.totalorder %s2137_s7, 0 }
  0x93   : > { %1340 = dma.done.wait (%p2153_p6), %s234_s18, 8224  }
  0x94   : > { %1342 = vsyncadd (%p2153_p6), %s234_s18, 4294959072  ;;  %v349_v0 = vld [vmem:[%s1735_s9 + $0x8] sm:$0xff]  ;;  %v351_v1 = vld [vmem:[%s1735_s9 + $0x18] sm:$0xff]  ;;  %s909_s7 = sshll.u32 %s235_s11, 1  ;;  %s276_s4 = sand.u32 1, %s1353_s13  }
  0x95   : > { %v348_v2 = vld [vmem:[%s1735_s9] sm:$0xff]  ;;  %v922_v3 = vpack.c.bf16 %v351_v1, %v349_v0  ;;  %v350_v4 = vld [vmem:[%s1735_s9 + $0x10] sm:$0xff]  ;;  %v353_v5 = vld [vmem:[%s1735_s9 + $0x28] sm:$0xff]  ;;  %s246_s27 = scalar_lea.vmem [#allocation7], %s909_s7  ;;  %s910_s10 = sshll.u32 %s276_s4, 9 }
  0x96   : > { %v355_v6 = vld [vmem:[%s1735_s9 + $0x38] sm:$0xff]  ;;  %v924_v7 = vpack.c.bf16 %v350_v4, %v348_v2  ;;  %v352_v9 = vld [vmem:[%s1735_s9 + $0x20] sm:$0xff]  ;;  %v354_v10 = vld [vmem:[%s1735_s9 + $0x30] sm:$0xff]  ;;  %s1882_s6 = scalar_lea.vmem [#allocation8], %s910_s10  ;;  %s2154_s24 = sld [smem:[#allocation16_spill]] }
  0x97   : > { %v926_v8 = vpack.c.bf16 %v355_v6, %v353_v5  ;;  %v357_v11 = vld [vmem:[%s1735_s9 + $0x48] sm:$0xff]  ;;  %923 = vmatprep.subr.bf16.mxu0 %v922_v3  ;;  %986 = vmatprep.subr.bf16.mxu1 %v922_v3  ;;  %v359_v12 = vld [vmem:[%s1735_s9 + $0x58] sm:$0xff]  ;;  %v928_v13 = vpack.c.bf16 %v354_v10, %v352_v9  ;;  %v356_v15 = vld [vmem:[%s1735_s9 + $0x40] sm:$0xff]  ;;  %s2155_s1 = sld [smem:[#allocation15_spill]]  ;;  %s762_s21 = sshll.u32 %s1882_s6, 4  ;;  %s2010_s21 = int_to_ptr.vmem [resolvable:$true] %s762_s21 }
  0x98   : > { %925 = vmatpush1.bf16.msra.mxu0 %v924_v7  ;;  %1002 = vmatpush1.bf16.msra.mxu1 %v924_v7  ;;  %v930_v14 = vpack.c.bf16 %v359_v12, %v357_v11  ;;  %v358_v16 = vld [vmem:[%s1735_s9 + $0x50] sm:$0xff]  ;;  %v361_v17 = vld [vmem:[%s1735_s9 + $0x68] sm:$0xff]  ;;  %v363_v18 = vld [vmem:[%s1735_s9 + $0x78] sm:$0xff]  ;;  %s2156_s23 = sld [smem:[#allocation25_spill]]  ;;  %s2020_s30 = scalar_lea.sflag [#allocation4], %s276_s4 }
  0x99   : > { %927 = vmatprep.subr.bf16.mxu0 %v926_v8  ;;  %987 = vmatprep.subr.bf16.mxu1 %v926_v8  ;;  %v932_v19 = vpack.c.bf16 %v358_v16, %v356_v15  ;;  %v934_v20 = vpack.c.bf16 %v363_v18, %v361_v17  ;;  %v360_v21 = vld [vmem:[%s1735_s9 + $0x60] sm:$0xff]  ;;  %v362_v22 = vld [vmem:[%s1735_s9 + $0x70] sm:$0xff]  ;;  %v365_v23 = vld [vmem:[%s1735_s9 + $0x88] sm:$0xff]  ;;  %s1251_s11 = scalar_lea.vmem %s2010_s21, 8192  ;;  %p2158_p11 = scmp.ne.s32.totalorder %s2142_s28, 0 }
  0x9a   : > { %v367_v24 = vld [vmem:[%s1735_s9 + $0x98] sm:$0xff]  ;;  %v936_v25 = vpack.c.bf16 %v362_v22, %v360_v21  ;;  %v364_v27 = vld [vmem:[%s1735_s9 + $0x80] sm:$0xff]  ;;  %v366_v28 = vld [vmem:[%s1735_s9 + $0x90] sm:$0xff]  ;;  %p1252_p7 = scmp.ne.s32.totalorder %s2010_s21, %s1251_s11  ;;  %s1409_s29 = smov [#allocation8]  }
  0x9b   : > { %v938_v26 = vpack.c.bf16 %v367_v24, %v365_v23  ;;  %v369_v29 = vld [vmem:[%s1735_s9 + $0xa8] sm:$0xff]  ;;  %v371_v30 = vld [vmem:[%s1735_s9 + $0xb8] sm:$0xff]  ;;  %v940_v31 = vpack.c.bf16 %v366_v28, %v364_v27  ;;  %v368_v33 = vld [vmem:[%s1735_s9 + $0xa0] sm:$0xff]  ;;  %s1255_s18 = sshll.u32 %s1409_s29, 4  ;;  %s1256_s18 = int_to_ptr.vmem [resolvable:$false] %s1255_s18 }
  0x9c   : > { %929 = vmatpush1.bf16.msra.mxu0 %v928_v13  ;;  %1003 = vmatpush1.bf16.msra.mxu1 %v928_v13  ;;  %v942_v32 = vpack.c.bf16 %v371_v30, %v369_v29  ;;  %v370_v34 = vld [vmem:[%s1735_s9 + $0xb0] sm:$0xff]  ;;  %v373_v35 = vld [vmem:[%s1735_s9 + $0xc8] sm:$0xff]  ;;  %v375_v36 = vld [vmem:[%s1735_s9 + $0xd8] sm:$0xff]  ;;  %s1018_s17 = smul.u32 192, %s2154_s24  ;;  %p1253_p5 = pnand %p1252_p7, %p2158_p11 }
  0x9d   : > { %931 = vmatprep.subr.bf16.mxu0 %v930_v14  ;;  %988 = vmatprep.subr.bf16.mxu1 %v930_v14  ;;  %v944_v37 = vpack.c.bf16 %v370_v34, %v368_v33  ;;  %v372_v38 = vld [vmem:[%s1735_s9 + $0xc0] sm:$0xff]  ;;  %v946_v39 = vpack.c.bf16 %v375_v36, %v373_v35  ;;  %v374_v40 = vld [vmem:[%s1735_s9 + $0xd0] sm:$0xff]  ;;  %v285_v41 = vld [vmem:[%s1725_s26 + $0x8] sm:$0xff]  ;;  %s913_s22 = sshll.u32 %s2155_s1, 1  ;;  %p1258_p3 = scmp.lt.s32.totalorder %s2010_s21, %s1256_s18 }
  0x9e   : > { %v317_v42 = vld [vmem:[%s1725_s26 + $0x108] sm:$0xff]  ;;  %v379_v44 = vld [vmem:[%s1735_s9 + $0xf8] sm:$0xff]  ;;  %488 = vmatprep.mubr.f32.mxu0 %v285_v41  ;;  %v948_v45 = vpack.c.bf16 %v374_v40, %v372_v38  ;;  %v376_v47 = vld [vmem:[%s1735_s9 + $0xe0] sm:$0xff]  ;;  %s759_s3 = sadd.s32 %s1018_s17, %s913_s22  ;;  %p1254_p2 = pneg %p1253_p5 }
  0x9f   : > { %v377_v43 = vld [vmem:[%s1735_s9 + $0xe8] sm:$0xff]  ;;  %584 = vmatprep.mubr.f32.mxu1 %v317_v42  ;;  %v378_v48 = vld [vmem:[%s1735_s9 + $0xf0] sm:$0xff]  ;;  %v383_v50 = vld [vmem:[%s1735_s9 + $0x118] sm:$0xff]  ;;  %s915_s20 = sshll.u32 %s759_s3, 7 }
  0xa0   : > { %933 = vmatpush1.bf16.msra.mxu0 %v932_v19  ;;  %1004 = vmatpush1.bf16.msra.mxu1 %v932_v19  ;;  %v950_v46 = vpack.c.bf16 %v379_v44, %v377_v43  ;;  %v381_v49 = vld [vmem:[%s1735_s9 + $0x108] sm:$0xff]  ;;  %v952_v51 = vpack.c.bf16 %v378_v48, %v376_v47  ;;  %v380_v53 = vld [vmem:[%s1735_s9 + $0x100] sm:$0xff]  ;;  %v382_v54 = vld [vmem:[%s1735_s9 + $0x110] sm:$0xff]  ;;  %s2006_s15 = scalar_lea.hbm %s2156_s23, %s915_s20 }
  0xa1   : > { %935 = vmatprep.subr.bf16.mxu0 %v934_v20  ;;  %989 = vmatprep.subr.bf16.mxu1 %v934_v20  ;;  %v954_v52 = vpack.c.bf16 %v383_v50, %v381_v49  ;;  %v385_v55 = vld [vmem:[%s1735_s9 + $0x128] sm:$0xff]  ;;  %v387_v56 = vld [vmem:[%s1735_s9 + $0x138] sm:$0xff]  ;;  %v956_v57 = vpack.c.bf16 %v382_v54, %v380_v53  ;;  %v384_v59 = vld [vmem:[%s1735_s9 + $0x120] sm:$0xff] }
  0xa2   : > { %v958_v58 = vpack.c.bf16 %v387_v56, %v385_v55  ;;  %v386_v60 = vld [vmem:[%s1735_s9 + $0x130] sm:$0xff]  ;;  %v389_v61 = vld [vmem:[%s1735_s9 + $0x148] sm:$0xff]  ;;  %v391_v62 = vld [vmem:[%s1735_s9 + $0x158] sm:$0xff] }
  0xa3   : > { %v960_v63 = vpack.c.bf16 %v386_v60, %v384_v59  ;;  %v962_v0 = vpack.c.bf16 %v391_v62, %v389_v61  ;;  %v388_v1 = vld [vmem:[%s1735_s9 + $0x140] sm:$0xff]  ;;  %v390_v2 = vld [vmem:[%s1735_s9 + $0x150] sm:$0xff]  ;;  %v393_v3 = vld [vmem:[%s1735_s9 + $0x168] sm:$0xff] }
  0xa4   : > { %937 = vmatpush1.bf16.msra.mxu0 %v936_v25  ;;  %1005 = vmatpush1.bf16.msra.mxu1 %v936_v25  ;;  %v395_v4 = vld [vmem:[%s1735_s9 + $0x178] sm:$0xff]  ;;  %v964_v5 = vpack.c.bf16 %v390_v2, %v388_v1  ;;  %v392_v7 = vld [vmem:[%s1735_s9 + $0x160] sm:$0xff]  ;;  %v394_v8 = vld [vmem:[%s1735_s9 + $0x170] sm:$0xff] }
  0xa5   : > { %939 = vmatprep.subr.bf16.mxu0 %v938_v26  ;;  %990 = vmatprep.subr.bf16.mxu1 %v938_v26  ;;  %v966_v6 = vpack.c.bf16 %v395_v4, %v393_v3  ;;  %v397_v9 = vld [vmem:[%s1735_s9 + $0x188] sm:$0xff]  ;;  %v399_v10 = vld [vmem:[%s1735_s9 + $0x198] sm:$0xff]  ;;  %v968_v11 = vpack.c.bf16 %v394_v8, %v392_v7  ;;  %v396_v13 = vld [vmem:[%s1735_s9 + $0x180] sm:$0xff] }
  0xa6   : > { %v970_v12 = vpack.c.bf16 %v399_v10, %v397_v9  ;;  %v398_v14 = vld [vmem:[%s1735_s9 + $0x190] sm:$0xff]  ;;  %v401_v15 = vld [vmem:[%s1735_s9 + $0x1a8] sm:$0xff]  ;;  %v403_v16 = vld [vmem:[%s1735_s9 + $0x1b8] sm:$0xff] }
  0xa7   : > { %v972_v17 = vpack.c.bf16 %v398_v14, %v396_v13  ;;  %v974_v18 = vpack.c.bf16 %v403_v16, %v401_v15  ;;  %v400_v19 = vld [vmem:[%s1735_s9 + $0x1a0] sm:$0xff]  ;;  %v402_v20 = vld [vmem:[%s1735_s9 + $0x1b0] sm:$0xff]  ;;  %v405_v21 = vld [vmem:[%s1735_s9 + $0x1c8] sm:$0xff] }
  0xa8   : > { %941 = vmatpush1.bf16.msra.mxu0 %v940_v31  ;;  %1006 = vmatpush1.bf16.msra.mxu1 %v940_v31  ;;  %v407_v22 = vld [vmem:[%s1735_s9 + $0x1d8] sm:$0xff]  ;;  %v976_v23 = vpack.c.bf16 %v402_v20, %v400_v19  ;;  %v404_v25 = vld [vmem:[%s1735_s9 + $0x1c0] sm:$0xff]  ;;  %v406_v26 = vld [vmem:[%s1735_s9 + $0x1d0] sm:$0xff] }
  0xa9   : > { %943 = vmatprep.subr.bf16.mxu0 %v942_v32  ;;  %991 = vmatprep.subr.bf16.mxu1 %v942_v32  ;;  %v978_v24 = vpack.c.bf16 %v407_v22, %v405_v21  ;;  %v409_v27 = vld [vmem:[%s1735_s9 + $0x1e8] sm:$0xff]  ;;  %v411_v28 = vld [vmem:[%s1735_s9 + $0x1f8] sm:$0xff]  ;;  %v980_v29 = vpack.c.bf16 %v406_v26, %v404_v25  ;;  %v408_v31 = vld [vmem:[%s1735_s9 + $0x1e0] sm:$0xff] }
  0xaa   : > { %v982_v30 = vpack.c.bf16 %v411_v28, %v409_v27  ;;  %v410_v32 = vld [vmem:[%s1735_s9 + $0x1f0] sm:$0xff]  ;;  %v284_v34 = vld [vmem:[%s1725_s26] sm:$0xff]  ;;  %v287_v36 = vld [vmem:[%s1725_s26 + $0x18] sm:$0xff]  ;;  %s1257_s9 = scalar_lea.vmem %s1256_s18, 16384 }
  0xab   : > { %v984_v33 = vpack.c.bf16 %v410_v32, %v408_v31  ;;  %v316_v35 = vld [vmem:[%s1725_s26 + $0x100] sm:$0xff]  ;;  %v286_v38 = vld [vmem:[%s1725_s26 + $0x10] sm:$0xff]  ;;  %v289_v40 = vld [vmem:[%s1725_s26 + $0x28] sm:$0xff]  ;;  %v414_v32 = vlaneseq  ;;  %p1259_p9 = scmp.lt.s32.totalorder %s1257_s9, %s1251_s11 }
  0xac   : > { %945 = vmatpush1.bf16.msra.mxu0 %v944_v37  ;;  %1007 = vmatpush1.bf16.msra.mxu1 %v944_v37  ;;  %v319_v37 = vld [vmem:[%s1725_s26 + $0x118] sm:$0xff]  ;;  %v321_v41 = vld [vmem:[%s1725_s26 + $0x128] sm:$0xff]  ;;  %v288_v42 = vld [vmem:[%s1725_s26 + $0x20] sm:$0xff] }
  0xad   : > { %947 = vmatprep.subr.bf16.mxu0 %v946_v39  ;;  %992 = vmatprep.subr.bf16.mxu1 %v946_v39  ;;  %v318_v39 = vld [vmem:[%s1725_s26 + $0x110] sm:$0xff]  ;;  %v320_v43 = vld [vmem:[%s1725_s26 + $0x120] sm:$0xff]  ;;  %v291_v44 = vld [vmem:[%s1725_s26 + $0x38] sm:$0xff]  ;;  %p1260_p4 = por %p1259_p9, %p1258_p3 }
  0xae   : > { %v322_v47 = vld [vmem:[%s1725_s26 + $0x130] sm:$0xff]  ;;  %v293_v48 = vld [vmem:[%s1725_s26 + $0x48] sm:$0xff]  ;;  %v292_v50 = vld [vmem:[%s1725_s26 + $0x40] sm:$0xff] }
  0xaf   : > { %v325_v49 = vld [vmem:[%s1725_s26 + $0x148] sm:$0xff]  ;;  %v327_v53 = vld [vmem:[%s1725_s26 + $0x158] sm:$0xff]  ;;  %v294_v54 = vld [vmem:[%s1725_s26 + $0x50] sm:$0xff]  ;;  %p1261_p1 = pnand %p1260_p4, %p1254_p2 }
  0xb0   : > { %949 = vmatpush1.bf16.msra.mxu0 %v948_v45  ;;  %1008 = vmatpush1.bf16.msra.mxu1 %v948_v45  ;;  %v323_v45 = vld [vmem:[%s1725_s26 + $0x138] sm:$0xff]  ;;  %v326_v55 = vld [vmem:[%s1725_s26 + $0x150] sm:$0xff]  ;;  %v297_v56 = vld [vmem:[%s1725_s26 + $0x68] sm:$0xff] }
  0xb1   : > { %951 = vmatprep.subr.bf16.mxu0 %v950_v46  ;;  %993 = vmatprep.subr.bf16.mxu1 %v950_v46  ;;  %v290_v46 = vld [vmem:[%s1725_s26 + $0x30] sm:$0xff]  ;;  %v328_v59 = vld [vmem:[%s1725_s26 + $0x160] sm:$0xff]  ;;  %v299_v60 = vld [vmem:[%s1725_s26 + $0x78] sm:$0xff] }
  0xb2   : > { %v331_v61 = vld [vmem:[%s1725_s26 + $0x178] sm:$0xff]  ;;  %v298_v62 = vld [vmem:[%s1725_s26 + $0x70] sm:$0xff]  ;;  %v333_v1 = vld [vmem:[%s1725_s26 + $0x188] sm:$0xff] }
  0xb3   : > { %v300_v2 = vld [vmem:[%s1725_s26 + $0x80] sm:$0xff]  ;;  %v303_v4 = vld [vmem:[%s1725_s26 + $0x98] sm:$0xff]  ;;  %v334_v7 = vld [vmem:[%s1725_s26 + $0x190] sm:$0xff] }
  0xb4   : > { %953 = vmatpush1.bf16.msra.mxu0 %v952_v51  ;;  %1009 = vmatpush1.bf16.msra.mxu1 %v952_v51  ;;  %v324_v51 = vld [vmem:[%s1725_s26 + $0x140] sm:$0xff]  ;;  %v305_v8 = vld [vmem:[%s1725_s26 + $0xa8] sm:$0xff]  ;;  %v339_v13 = vld [vmem:[%s1725_s26 + $0x1b8] sm:$0xff] }
  0xb5   : > { %955 = vmatprep.subr.bf16.mxu0 %v954_v52  ;;  %994 = vmatprep.subr.bf16.mxu1 %v954_v52  ;;  %v295_v52 = vld [vmem:[%s1725_s26 + $0x58] sm:$0xff]  ;;  %v332_v3 = vld [vmem:[%s1725_s26 + $0x180] sm:$0xff]  ;;  %v337_v9 = vld [vmem:[%s1725_s26 + $0x1a8] sm:$0xff] }
  0xb6   : > { %v304_v10 = vld [vmem:[%s1725_s26 + $0xa0] sm:$0xff]  ;;  %v306_v14 = vld [vmem:[%s1725_s26 + $0xb0] sm:$0xff]  ;;  %v309_v16 = vld [vmem:[%s1725_s26 + $0xc8] sm:$0xff] }
  0xb7   : > { %v338_v15 = vld [vmem:[%s1725_s26 + $0x1b0] sm:$0xff]  ;;  %v340_v19 = vld [vmem:[%s1725_s26 + $0x1c0] sm:$0xff]  ;;  %v311_v20 = vld [vmem:[%s1725_s26 + $0xd8] sm:$0xff] }
  0xb8   : > { %957 = vmatpush1.bf16.msra.mxu0 %v956_v57  ;;  %1010 = vmatpush1.bf16.msra.mxu1 %v956_v57  ;;  %v329_v57 = vld [vmem:[%s1725_s26 + $0x168] sm:$0xff]  ;;  %v343_v21 = vld [vmem:[%s1725_s26 + $0x1d8] sm:$0xff]  ;;  %v310_v22 = vld [vmem:[%s1725_s26 + $0xd0] sm:$0xff] }
  0xb9   : > { %959 = vmatprep.subr.bf16.mxu0 %v958_v58  ;;  %995 = vmatprep.subr.bf16.mxu1 %v958_v58  ;;  %v296_v58 = vld [vmem:[%s1725_s26 + $0x60] sm:$0xff]  ;;  %v345_v25 = vld [vmem:[%s1725_s26 + $0x1e8] sm:$0xff]  ;;  %v315_v28 = vld [vmem:[%s1725_s26 + $0xf8] sm:$0xff] }
  0xba   : > { %v312_v26 = vld [vmem:[%s1725_s26 + $0xe0] sm:$0xff]  ;;  %v346_v31 = vld [vmem:[%s1725_s26 + $0x1f0] sm:$0xff] }
  0xbb   : > { %v344_v27 = vld [vmem:[%s1725_s26 + $0x1e0] sm:$0xff] }
  0xbc   : > { %961 = vmatpush1.bf16.msra.mxu0 %v960_v63  ;;  %1011 = vmatpush1.bf16.msra.mxu1 %v960_v63  ;;  %v330_v63 = vld [vmem:[%s1725_s26 + $0x170] sm:$0xff] }
  0xbd   : > { %963 = vmatprep.subr.bf16.mxu0 %v962_v0  ;;  %996 = vmatprep.subr.bf16.mxu1 %v962_v0  ;;  %v301_v0 = vld [vmem:[%s1725_s26 + $0x88] sm:$0xff] }
  0xc0   : > { %965 = vmatpush1.bf16.msra.mxu0 %v964_v5  ;;  %1012 = vmatpush1.bf16.msra.mxu1 %v964_v5  ;;  %v335_v5 = vld [vmem:[%s1725_s26 + $0x198] sm:$0xff] }
  0xc1   : > { %967 = vmatprep.subr.bf16.mxu0 %v966_v6  ;;  %997 = vmatprep.subr.bf16.mxu1 %v966_v6  ;;  %v302_v6 = vld [vmem:[%s1725_s26 + $0x90] sm:$0xff] }
  0xc4   : > { %969 = vmatpush1.bf16.msra.mxu0 %v968_v11  ;;  %1013 = vmatpush1.bf16.msra.mxu1 %v968_v11  ;;  %v336_v11 = vld [vmem:[%s1725_s26 + $0x1a0] sm:$0xff] }
  0xc5   : > { %971 = vmatprep.subr.bf16.mxu0 %v970_v12  ;;  %998 = vmatprep.subr.bf16.mxu1 %v970_v12  ;;  %v307_v12 = vld [vmem:[%s1725_s26 + $0xb8] sm:$0xff] }
  0xc8   : > { %973 = vmatpush1.bf16.msra.mxu0 %v972_v17  ;;  %1014 = vmatpush1.bf16.msra.mxu1 %v972_v17  ;;  %v341_v17 = vld [vmem:[%s1725_s26 + $0x1c8] sm:$0xff] }
  0xc9   : > { %975 = vmatprep.subr.bf16.mxu0 %v974_v18  ;;  %999 = vmatprep.subr.bf16.mxu1 %v974_v18  ;;  %v308_v18 = vld [vmem:[%s1725_s26 + $0xc0] sm:$0xff] }
  0xcc   : > { %977 = vmatpush1.bf16.msra.mxu0 %v976_v23  ;;  %1015 = vmatpush1.bf16.msra.mxu1 %v976_v23  ;;  %v342_v23 = vld [vmem:[%s1725_s26 + $0x1d0] sm:$0xff] }
  0xcd   : > { %979 = vmatprep.subr.bf16.mxu0 %v978_v24  ;;  %1000 = vmatprep.subr.bf16.mxu1 %v978_v24  ;;  %v313_v24 = vld [vmem:[%s1725_s26 + $0xe8] sm:$0xff] }
  0xd0   : > { %981 = vmatpush1.bf16.msra.mxu0 %v980_v29  ;;  %1016 = vmatpush1.bf16.msra.mxu1 %v980_v29  ;;  %v347_v29 = vld [vmem:[%s1725_s26 + $0x1f8] sm:$0xff] }
  0xd1   : > { %983 = vmatprep.subr.bf16.mxu0 %v982_v30  ;;  %1001 = vmatprep.subr.bf16.mxu1 %v982_v30  ;;  %v314_v30 = vld [vmem:[%s1725_s26 + $0xf0] sm:$0xff]  ;;  %s2157_s26 = smov %s2156_s23 }
  0xd4   : > { %985 = vmatpush1.bf16.msra.mxu0 %v984_v33  ;;  %1017 = vmatpush1.bf16.msra.mxu1 %v984_v33  ;;  %v415_v33 = vshrl.u32 %v414_v32, 7 }
  0xd7   : > { %489 = vmatmul.mubr.f32.vlgmr.msra.gmra.mrb[0].mxu0 %v284_v34  ;;  %585 = vmatmul.mubr.f32.vlgmr.msra.gmra.mrb[0].mxu1 %v316_v35  ;;  %v416_v34 = vsub.s32 0, %v415_v33  ;;  %v412_v35 = vld [vmem:[%s246_s27] sm:$0x3] }
  0xd8   : > { %494 = vmatprep.mubr.f32.mxu0 %v287_v36  ;;  %590 = vmatprep.mubr.f32.mxu1 %v319_v37  ;;  %v420_v36 = vsub.s32 1, %v415_v33 }
  0xd9   : > { %v1874_v37 = vrot.slane %v412_v35, %v416_v34 }
  0xdb   : > { %495 = vmatmul.mubr.f32.gmra.mrb[2].mxu0 %v286_v38  ;;  %591 = vmatmul.mubr.f32.gmra.mrb[2].mxu1 %v318_v39  ;;  %v1876_v38 = vrot.slane %v412_v35, %v420_v36 }
  0xdc   : > { %500 = vmatprep.mubr.f32.mxu0 %v289_v40  ;;  %596 = vmatprep.mubr.f32.mxu1 %v321_v41 }
  0xdf   : > { %501 = vmatmul.mubr.f32.gmra.mrb[4].mxu0 %v288_v42  ;;  %597 = vmatmul.mubr.f32.gmra.mrb[4].mxu1 %v320_v43 }
  0xe0   : > { %506 = vmatprep.mubr.f32.mxu0 %v291_v44  ;;  %602 = vmatprep.mubr.f32.mxu1 %v323_v45 }
  0xe3   : > { %507 = vmatmul.mubr.f32.gmra.mrb[6].mxu0 %v290_v46  ;;  %603 = vmatmul.mubr.f32.gmra.mrb[6].mxu1 %v322_v47 }
  0xe4   : > { %512 = vmatprep.mubr.f32.mxu0 %v293_v48  ;;  %608 = vmatprep.mubr.f32.mxu1 %v325_v49 }
  0xe7   : > { %513 = vmatmul.mubr.f32.gmra.mrb[8].mxu0 %v292_v50  ;;  %609 = vmatmul.mubr.f32.gmra.mrb[8].mxu1 %v324_v51 }
  0xe8   : > { %518 = vmatprep.mubr.f32.mxu0 %v295_v52  ;;  %614 = vmatprep.mubr.f32.mxu1 %v327_v53 }
  0xeb   : > { %519 = vmatmul.mubr.f32.gmra.mrb[10].mxu0 %v294_v54  ;;  %615 = vmatmul.mubr.f32.gmra.mrb[10].mxu1 %v326_v55 }
  0xec   : > { %524 = vmatprep.mubr.f32.mxu0 %v297_v56  ;;  %620 = vmatprep.mubr.f32.mxu1 %v329_v57 }
  0xef   : > { %525 = vmatmul.mubr.f32.gmra.mrb[12].mxu0 %v296_v58  ;;  %621 = vmatmul.mubr.f32.gmra.mrb[12].mxu1 %v328_v59 }
  0xf0   : > { %530 = vmatprep.mubr.f32.mxu0 %v299_v60  ;;  %626 = vmatprep.mubr.f32.mxu1 %v331_v61 }
  0xf3   : > { %531 = vmatmul.mubr.f32.gmra.mrb[14].mxu0 %v298_v62  ;;  %627 = vmatmul.mubr.f32.gmra.mrb[14].mxu1 %v330_v63 }
  0xf4   : > { %536 = vmatprep.mubr.f32.mxu0 %v301_v0  ;;  %632 = vmatprep.mubr.f32.mxu1 %v333_v1 }
  0xf7   : > { %537 = vmatmul.mubr.f32.gmra.mrb[16].mxu0 %v300_v2  ;;  %633 = vmatmul.mubr.f32.gmra.mrb[16].mxu1 %v332_v3 }
  0xf8   : > { %542 = vmatprep.mubr.f32.mxu0 %v303_v4  ;;  %638 = vmatprep.mubr.f32.mxu1 %v335_v5 }
  0xfb   : > { %543 = vmatmul.mubr.f32.gmra.mrb[18].mxu0 %v302_v6  ;;  %639 = vmatmul.mubr.f32.gmra.mrb[18].mxu1 %v334_v7 }
  0xfc   : > { %548 = vmatprep.mubr.f32.mxu0 %v305_v8  ;;  %644 = vmatprep.mubr.f32.mxu1 %v337_v9 }
  0xff   : > { %549 = vmatmul.mubr.f32.gmra.mrb[20].mxu0 %v304_v10  ;;  %645 = vmatmul.mubr.f32.gmra.mrb[20].mxu1 %v336_v11 }
 0x100   : > { %554 = vmatprep.mubr.f32.mxu0 %v307_v12  ;;  %650 = vmatprep.mubr.f32.mxu1 %v339_v13 }
 0x103   : > { %555 = vmatmul.mubr.f32.gmra.mrb[22].mxu0 %v306_v14  ;;  %651 = vmatmul.mubr.f32.gmra.mrb[22].mxu1 %v338_v15 }
 0x104   : > { %560 = vmatprep.mubr.f32.mxu0 %v309_v16  ;;  %656 = vmatprep.mubr.f32.mxu1 %v341_v17 }
 0x107   : > { %561 = vmatmul.mubr.f32.gmra.mrb[24].mxu0 %v308_v18  ;;  %657 = vmatmul.mubr.f32.gmra.mrb[24].mxu1 %v340_v19 }
 0x108   : > { %566 = vmatprep.mubr.f32.mxu0 %v311_v20  ;;  %662 = vmatprep.mubr.f32.mxu1 %v343_v21 }
 0x10b   : > { %567 = vmatmul.mubr.f32.gmra.mrb[26].mxu0 %v310_v22  ;;  %663 = vmatmul.mubr.f32.gmra.mrb[26].mxu1 %v342_v23 }
 0x10c   : > { %572 = vmatprep.mubr.f32.mxu0 %v313_v24  ;;  %668 = vmatprep.mubr.f32.mxu1 %v345_v25 }
 0x10f   : > { %573 = vmatmul.mubr.f32.gmra.mrb[28].mxu0 %v312_v26  ;;  %669 = vmatmul.mubr.f32.gmra.mrb[28].mxu1 %v344_v27 }
 0x110   : > { %578 = vmatprep.mubr.f32.mxu0 %v315_v28  ;;  %674 = vmatprep.mubr.f32.mxu1 %v347_v29 }
 0x113   : > { %579 = vmatmul.mubr.f32.gmra.mrb[30].mxu0 %v314_v30  ;;  %675 = vmatmul.mubr.f32.gmra.mrb[30].mxu1 %v346_v31 }
 0x1aa   : > { %v490_v39 = vpop.f32.mrb[0].mxu0  ;;  %v586_v40 = vpop.f32.mrb[0].mxu1 }
 0x1ab   : > { %v491_v41 = vadd.f32 %v490_v39, %v1874_v37  ;;  %v587_v42 = vadd.f32 %v586_v40, %v1874_v37  ;;  %v492_v43 = vpop.f32.mrb[1].mxu0  ;;  %v588_v44 = vpop.f32.mrb[1].mxu1 }
 0x1ac   : > { %v493_v45 = vadd.f32 %v492_v43, %v1876_v38  ;;  %v589_v46 = vadd.f32 %v588_v44, %v1876_v38 }
 0x1ad   : > { %681 = vst [vmem:[%s1882_s6] sm:$0xff] %v491_v41  ;;  %713 = vst [vmem:[%s1882_s6 + $0x100] sm:$0xff] %v587_v42 }
 0x1ae   : > { %682 = vst [vmem:[%s1882_s6 + $0x8] sm:$0xff] %v493_v45  ;;  %714 = vst [vmem:[%s1882_s6 + $0x108] sm:$0xff] %v589_v46  ;;  %v496_v47 = vpop.f32.mrb[2].mxu0  ;;  %v592_v48 = vpop.f32.mrb[2].mxu1 }
 0x1af   : > { %v497_v49 = vadd.f32 %v496_v47, %v1874_v37  ;;  %v593_v50 = vadd.f32 %v592_v48, %v1874_v37  ;;  %v498_v51 = vpop.f32.mrb[3].mxu0  ;;  %v594_v52 = vpop.f32.mrb[3].mxu1 }
 0x1b0   : > { %v499_v53 = vadd.f32 %v498_v51, %v1876_v38  ;;  %v595_v54 = vadd.f32 %v594_v52, %v1876_v38 }
 0x1b1   : > { %683 = vst [vmem:[%s1882_s6 + $0x10] sm:$0xff] %v497_v49  ;;  %715 = vst [vmem:[%s1882_s6 + $0x110] sm:$0xff] %v593_v50 }
 0x1b2   : > { %684 = vst [vmem:[%s1882_s6 + $0x18] sm:$0xff] %v499_v53  ;;  %716 = vst [vmem:[%s1882_s6 + $0x118] sm:$0xff] %v595_v54  ;;  %v502_v55 = vpop.f32.mrb[4].mxu0  ;;  %v598_v56 = vpop.f32.mrb[4].mxu1 }
 0x1b3   : > { %v503_v57 = vadd.f32 %v502_v55, %v1874_v37  ;;  %v599_v58 = vadd.f32 %v598_v56, %v1874_v37  ;;  %v504_v59 = vpop.f32.mrb[5].mxu0  ;;  %v600_v60 = vpop.f32.mrb[5].mxu1 }
 0x1b4   : > { %v505_v61 = vadd.f32 %v504_v59, %v1876_v38  ;;  %v601_v62 = vadd.f32 %v600_v60, %v1876_v38 }
 0x1b5   : > { %685 = vst [vmem:[%s1882_s6 + $0x20] sm:$0xff] %v503_v57  ;;  %717 = vst [vmem:[%s1882_s6 + $0x120] sm:$0xff] %v599_v58 }
 0x1b6   : > { %686 = vst [vmem:[%s1882_s6 + $0x28] sm:$0xff] %v505_v61  ;;  %718 = vst [vmem:[%s1882_s6 + $0x128] sm:$0xff] %v601_v62  ;;  %v508_v63 = vpop.f32.mrb[6].mxu0  ;;  %v604_v0 = vpop.f32.mrb[6].mxu1 }
 0x1b7   : > { %v509_v1 = vadd.f32 %v508_v63, %v1874_v37  ;;  %v605_v2 = vadd.f32 %v604_v0, %v1874_v37  ;;  %v510_v3 = vpop.f32.mrb[7].mxu0  ;;  %v606_v4 = vpop.f32.mrb[7].mxu1 }
 0x1b8   : > { %v511_v5 = vadd.f32 %v510_v3, %v1876_v38  ;;  %v607_v6 = vadd.f32 %v606_v4, %v1876_v38 }
 0x1b9   : > { %687 = vst [vmem:[%s1882_s6 + $0x30] sm:$0xff] %v509_v1  ;;  %719 = vst [vmem:[%s1882_s6 + $0x130] sm:$0xff] %v605_v2 }
 0x1ba   : > { %688 = vst [vmem:[%s1882_s6 + $0x38] sm:$0xff] %v511_v5  ;;  %720 = vst [vmem:[%s1882_s6 + $0x138] sm:$0xff] %v607_v6  ;;  %v514_v7 = vpop.f32.mrb[8].mxu0  ;;  %v610_v8 = vpop.f32.mrb[8].mxu1 }
 0x1bb   : > { %v515_v9 = vadd.f32 %v514_v7, %v1874_v37  ;;  %v611_v10 = vadd.f32 %v610_v8, %v1874_v37  ;;  %v516_v11 = vpop.f32.mrb[9].mxu0  ;;  %v612_v12 = vpop.f32.mrb[9].mxu1 }
 0x1bc   : > { %v517_v13 = vadd.f32 %v516_v11, %v1876_v38  ;;  %v613_v14 = vadd.f32 %v612_v12, %v1876_v38 }
 0x1bd   : > { %689 = vst [vmem:[%s1882_s6 + $0x40] sm:$0xff] %v515_v9  ;;  %721 = vst [vmem:[%s1882_s6 + $0x140] sm:$0xff] %v611_v10 }
 0x1be   : > { %690 = vst [vmem:[%s1882_s6 + $0x48] sm:$0xff] %v517_v13  ;;  %722 = vst [vmem:[%s1882_s6 + $0x148] sm:$0xff] %v613_v14  ;;  %v520_v15 = vpop.f32.mrb[10].mxu0  ;;  %v616_v16 = vpop.f32.mrb[10].mxu1 }
 0x1bf   : > { %v521_v17 = vadd.f32 %v520_v15, %v1874_v37  ;;  %v617_v18 = vadd.f32 %v616_v16, %v1874_v37  ;;  %v522_v19 = vpop.f32.mrb[11].mxu0  ;;  %v618_v20 = vpop.f32.mrb[11].mxu1 }
 0x1c0   : > { %v523_v21 = vadd.f32 %v522_v19, %v1876_v38  ;;  %v619_v22 = vadd.f32 %v618_v20, %v1876_v38 }
 0x1c1   : > { %691 = vst [vmem:[%s1882_s6 + $0x50] sm:$0xff] %v521_v17  ;;  %723 = vst [vmem:[%s1882_s6 + $0x150] sm:$0xff] %v617_v18 }
 0x1c2   : > { %692 = vst [vmem:[%s1882_s6 + $0x58] sm:$0xff] %v523_v21  ;;  %724 = vst [vmem:[%s1882_s6 + $0x158] sm:$0xff] %v619_v22  ;;  %v526_v23 = vpop.f32.mrb[12].mxu0  ;;  %v622_v24 = vpop.f32.mrb[12].mxu1 }
 0x1c3   : > { %v527_v25 = vadd.f32 %v526_v23, %v1874_v37  ;;  %v623_v26 = vadd.f32 %v622_v24, %v1874_v37  ;;  %v528_v27 = vpop.f32.mrb[13].mxu0  ;;  %v624_v28 = vpop.f32.mrb[13].mxu1 }
 0x1c4   : > { %v529_v29 = vadd.f32 %v528_v27, %v1876_v38  ;;  %v625_v30 = vadd.f32 %v624_v28, %v1876_v38 }
 0x1c5   : > { %693 = vst [vmem:[%s1882_s6 + $0x60] sm:$0xff] %v527_v25  ;;  %725 = vst [vmem:[%s1882_s6 + $0x160] sm:$0xff] %v623_v26 }
 0x1c6   : > { %694 = vst [vmem:[%s1882_s6 + $0x68] sm:$0xff] %v529_v29  ;;  %726 = vst [vmem:[%s1882_s6 + $0x168] sm:$0xff] %v625_v30  ;;  %v532_v31 = vpop.f32.mrb[14].mxu0  ;;  %v628_v32 = vpop.f32.mrb[14].mxu1 }
 0x1c7   : > { %v533_v33 = vadd.f32 %v532_v31, %v1874_v37  ;;  %v629_v34 = vadd.f32 %v628_v32, %v1874_v37  ;;  %v534_v35 = vpop.f32.mrb[15].mxu0  ;;  %v630_v36 = vpop.f32.mrb[15].mxu1 }
 0x1c8   : > { %v535_v39 = vadd.f32 %v534_v35, %v1876_v38  ;;  %v631_v40 = vadd.f32 %v630_v36, %v1876_v38 }
 0x1c9   : > { %695 = vst [vmem:[%s1882_s6 + $0x70] sm:$0xff] %v533_v33  ;;  %727 = vst [vmem:[%s1882_s6 + $0x170] sm:$0xff] %v629_v34 }
 0x1ca   : > { %696 = vst [vmem:[%s1882_s6 + $0x78] sm:$0xff] %v535_v39  ;;  %728 = vst [vmem:[%s1882_s6 + $0x178] sm:$0xff] %v631_v40  ;;  %v538_v41 = vpop.f32.mrb[16].mxu0  ;;  %v634_v42 = vpop.f32.mrb[16].mxu1 }
 0x1cb   : > { %v539_v43 = vadd.f32 %v538_v41, %v1874_v37  ;;  %v635_v44 = vadd.f32 %v634_v42, %v1874_v37  ;;  %v540_v45 = vpop.f32.mrb[17].mxu0  ;;  %v636_v46 = vpop.f32.mrb[17].mxu1 }
 0x1cc   : > { %v541_v47 = vadd.f32 %v540_v45, %v1876_v38  ;;  %v637_v48 = vadd.f32 %v636_v46, %v1876_v38 }
 0x1cd   : > { %697 = vst [vmem:[%s1882_s6 + $0x80] sm:$0xff] %v539_v43  ;;  %729 = vst [vmem:[%s1882_s6 + $0x180] sm:$0xff] %v635_v44 }
 0x1ce   : > { %698 = vst [vmem:[%s1882_s6 + $0x88] sm:$0xff] %v541_v47  ;;  %730 = vst [vmem:[%s1882_s6 + $0x188] sm:$0xff] %v637_v48  ;;  %v544_v49 = vpop.f32.mrb[18].mxu0  ;;  %v640_v50 = vpop.f32.mrb[18].mxu1 }
 0x1cf   : > { %v545_v51 = vadd.f32 %v544_v49, %v1874_v37  ;;  %v641_v52 = vadd.f32 %v640_v50, %v1874_v37  ;;  %v546_v53 = vpop.f32.mrb[19].mxu0  ;;  %v642_v54 = vpop.f32.mrb[19].mxu1 }
 0x1d0   : > { %v547_v55 = vadd.f32 %v546_v53, %v1876_v38  ;;  %v643_v56 = vadd.f32 %v642_v54, %v1876_v38 }
 0x1d1   : > { %699 = vst [vmem:[%s1882_s6 + $0x90] sm:$0xff] %v545_v51  ;;  %731 = vst [vmem:[%s1882_s6 + $0x190] sm:$0xff] %v641_v52 }
 0x1d2   : > { %700 = vst [vmem:[%s1882_s6 + $0x98] sm:$0xff] %v547_v55  ;;  %732 = vst [vmem:[%s1882_s6 + $0x198] sm:$0xff] %v643_v56  ;;  %v550_v57 = vpop.f32.mrb[20].mxu0  ;;  %v646_v58 = vpop.f32.mrb[20].mxu1 }
 0x1d3   : > { %v551_v59 = vadd.f32 %v550_v57, %v1874_v37  ;;  %v647_v60 = vadd.f32 %v646_v58, %v1874_v37  ;;  %v552_v61 = vpop.f32.mrb[21].mxu0  ;;  %v648_v62 = vpop.f32.mrb[21].mxu1 }
 0x1d4   : > { %v553_v63 = vadd.f32 %v552_v61, %v1876_v38  ;;  %v649_v0 = vadd.f32 %v648_v62, %v1876_v38 }
 0x1d5   : > { %701 = vst [vmem:[%s1882_s6 + $0xa0] sm:$0xff] %v551_v59  ;;  %733 = vst [vmem:[%s1882_s6 + $0x1a0] sm:$0xff] %v647_v60 }
 0x1d6   : > { %702 = vst [vmem:[%s1882_s6 + $0xa8] sm:$0xff] %v553_v63  ;;  %734 = vst [vmem:[%s1882_s6 + $0x1a8] sm:$0xff] %v649_v0  ;;  %v556_v1 = vpop.f32.mrb[22].mxu0  ;;  %v652_v2 = vpop.f32.mrb[22].mxu1 }
 0x1d7   : > { %v557_v3 = vadd.f32 %v556_v1, %v1874_v37  ;;  %v653_v4 = vadd.f32 %v652_v2, %v1874_v37  ;;  %v558_v5 = vpop.f32.mrb[23].mxu0  ;;  %v654_v6 = vpop.f32.mrb[23].mxu1 }
 0x1d8   : > { %v559_v7 = vadd.f32 %v558_v5, %v1876_v38  ;;  %v655_v8 = vadd.f32 %v654_v6, %v1876_v38 }
 0x1d9   : > { %703 = vst [vmem:[%s1882_s6 + $0xb0] sm:$0xff] %v557_v3  ;;  %735 = vst [vmem:[%s1882_s6 + $0x1b0] sm:$0xff] %v653_v4 }
 0x1da   : > { %704 = vst [vmem:[%s1882_s6 + $0xb8] sm:$0xff] %v559_v7  ;;  %736 = vst [vmem:[%s1882_s6 + $0x1b8] sm:$0xff] %v655_v8  ;;  %v562_v9 = vpop.f32.mrb[24].mxu0  ;;  %v658_v10 = vpop.f32.mrb[24].mxu1 }
 0x1db   : > { %v563_v11 = vadd.f32 %v562_v9, %v1874_v37  ;;  %v659_v12 = vadd.f32 %v658_v10, %v1874_v37  ;;  %v564_v13 = vpop.f32.mrb[25].mxu0  ;;  %v660_v14 = vpop.f32.mrb[25].mxu1 }
 0x1dc   : > { %v565_v15 = vadd.f32 %v564_v13, %v1876_v38  ;;  %v661_v16 = vadd.f32 %v660_v14, %v1876_v38 }
 0x1dd   : > { %705 = vst [vmem:[%s1882_s6 + $0xc0] sm:$0xff] %v563_v11  ;;  %737 = vst [vmem:[%s1882_s6 + $0x1c0] sm:$0xff] %v659_v12 }
 0x1de   : > { %706 = vst [vmem:[%s1882_s6 + $0xc8] sm:$0xff] %v565_v15  ;;  %738 = vst [vmem:[%s1882_s6 + $0x1c8] sm:$0xff] %v661_v16  ;;  %v568_v17 = vpop.f32.mrb[26].mxu0  ;;  %v664_v18 = vpop.f32.mrb[26].mxu1 }
 0x1df   : > { %v569_v19 = vadd.f32 %v568_v17, %v1874_v37  ;;  %v665_v20 = vadd.f32 %v664_v18, %v1874_v37  ;;  %v570_v21 = vpop.f32.mrb[27].mxu0  ;;  %v666_v22 = vpop.f32.mrb[27].mxu1 }
 0x1e0   : > { %v571_v23 = vadd.f32 %v570_v21, %v1876_v38  ;;  %v667_v24 = vadd.f32 %v666_v22, %v1876_v38 }
 0x1e1   : > { %707 = vst [vmem:[%s1882_s6 + $0xd0] sm:$0xff] %v569_v19  ;;  %739 = vst [vmem:[%s1882_s6 + $0x1d0] sm:$0xff] %v665_v20 }
 0x1e2   : > { %708 = vst [vmem:[%s1882_s6 + $0xd8] sm:$0xff] %v571_v23  ;;  %740 = vst [vmem:[%s1882_s6 + $0x1d8] sm:$0xff] %v667_v24  ;;  %v574_v25 = vpop.f32.mrb[28].mxu0  ;;  %v670_v26 = vpop.f32.mrb[28].mxu1 }
 0x1e3   : > { %v575_v27 = vadd.f32 %v574_v25, %v1874_v37  ;;  %v671_v28 = vadd.f32 %v670_v26, %v1874_v37  ;;  %v576_v29 = vpop.f32.mrb[29].mxu0  ;;  %v672_v30 = vpop.f32.mrb[29].mxu1 }
 0x1e4   : > { %v577_v31 = vadd.f32 %v576_v29, %v1876_v38  ;;  %v673_v32 = vadd.f32 %v672_v30, %v1876_v38 }
 0x1e5   : > { %709 = vst [vmem:[%s1882_s6 + $0xe0] sm:$0xff] %v575_v27  ;;  %741 = vst [vmem:[%s1882_s6 + $0x1e0] sm:$0xff] %v671_v28 }
 0x1e6   : > { %710 = vst [vmem:[%s1882_s6 + $0xe8] sm:$0xff] %v577_v31  ;;  %742 = vst [vmem:[%s1882_s6 + $0x1e8] sm:$0xff] %v673_v32  ;;  %v580_v33 = vpop.f32.mrb[30].mxu0  ;;  %v676_v34 = vpop.f32.mrb[30].mxu1 }
 0x1e7   : > { %v581_v35 = vadd.f32 %v580_v33, %v1874_v37  ;;  %v677_v36 = vadd.f32 %v676_v34, %v1874_v37  ;;  %v582_v39 = vpop.f32.mrb[31].mxu0  ;;  %v678_v40 = vpop.f32.mrb[31].mxu1 }
 0x1e8   : > { %v583_v41 = vadd.f32 %v582_v39, %v1876_v38  ;;  %v679_v42 = vadd.f32 %v678_v40, %v1876_v38 }
 0x1e9   : > { %711 = vst [vmem:[%s1882_s6 + $0xf0] sm:$0xff] %v581_v35  ;;  %743 = vst [vmem:[%s1882_s6 + $0x1f0] sm:$0xff] %v677_v36 }
 0x1ea   : > { %712 = vst [vmem:[%s1882_s6 + $0xf8] sm:$0xff] %v583_v41  ;;  %744 = vst [vmem:[%s1882_s6 + $0x1f8] sm:$0xff] %v679_v42 }
 0x1eb   : > { %1264 = shalt.err (!%p1261_p1)
}
 0x1ec   : > { %s1265_s7 = scalar_lea.hbm %s2006_s15, 8192  ;;  %s1269_s10 = scalar_lea.hbm %s2157_s26, 49152 }
 0x1ed   : > { %p1266_p0 = scmp.ne.s32.totalorder %s2006_s15, %s1265_s7  ;;  %p1270_p8 = scmp.lt.u32.totalorder %s2006_s15, %s2157_s26 }
 0x1ee   : > { %p1271_p10 = scmp.lt.u32.totalorder %s1269_s10, %s1265_s7  ;;  %p1273_p7 = scmp.lt.u32.totalorder %s1265_s7, %s2006_s15 }
 0x1ef   : > { %p1267_p12 = pnand %p1266_p0, %p2158_p11 }
 0x1f0   : > { %p1272_p6 = por %p1271_p10, %p1270_p8 }
 0x1f1   : > { %p1268_p13 = pneg %p1267_p12 }
 0x1f2   : > { %p1274_p5 = por %p1273_p7, %p1272_p6 }
 0x1f4   : > { %p1275_p2 = pnand %p1274_p5, %p1268_p13 }
 0x1f6   : > { %1278 = shalt.err (!%p1275_p2)
}
 0x1f7   : > { %s1410_s1 = smov 256   ;;  %s1411_s17 = smov 768  }
 0x1f8   : > { %s1412_s22 = smov 16  }
 0x1f9   : > { %1025 = dma.vmem_to_hbm [thread:$0]  (%p2158_p11), %s2010_s21, 8192, %s2006_s15, %s2020_s30, %s1410_s1, %s1411_s17, %s1412_s22  }
 0x1fa PF: > { %p1042_p3 = scmp.ge.s32.totalorder %s1401_s25, 2  ;;  %s777_s3 = sand.u32 1, %s1349_s12  }
 0x1fb   : > { %p2159_p9 = scmp.ne.s32.totalorder %s2143_s8, 0  ;;  %s778_s20 = scalar_lea.sflag [#allocation4], %s777_s3 }
 0x1fd   : > { %p1038_p4 = pnand %p1042_p3, %p2159_p9 }
 0x1ff   : > { %1344 = dma.done.wait (!%p1038_p4), %s778_s20, 8192  }
 0x200   : > { %1346 = vsyncadd (!%p1038_p4), %s778_s20, 4294959104  ;;  %s22_s25 = sadd.s32 1, %s1401_s25   ;;  %s2161_s28 = sld [smem:[#allocation12_spill]] }
 0x201   : > { %p2049_p1 = scmp.ge.s32.totalorder %s22_s25, 8   ;;  %s2162_s14 = sld [smem:[#allocation23_spill]] }
 0x202   : > { %s2163_s21 = sld [smem:[#allocation13_spill]]  ;;  %s2164_s17 = sld [smem:[#allocation21_spill]] }
 0x203   : > { %s2165_s23 = sld [smem:[#allocation14_spill]]  ;;  %s2166_s20 = sld [smem:[#allocation22_spill]] }
 0x204   : > { %s2167_s8 = sld [smem:[#allocation17_spill]]  ;;  %s2168_s22 = sld [smem:[#allocation18_spill]] }
 0x205   : > { %s2169_s30 = sld [smem:[#allocation19_spill]]  ;;  %s2170_s24 = sld [smem:[#allocation20_spill]] }
 0x206   : > { %s2171_s12 = smov %s1353_s13  ;;  %s2172_s13 = smov %s2161_s28 }
 0x207   : > { %s2173_s15 = smov %s1365_s16  ;;  %s2175_s18 = smov %s1377_s19 }
 0x208   : > { %s2174_s16 = smov %s2163_s21  ;;  %21 = sbr.rel (!%p2049_p1) target bundleno = 15 (0xf), region = 101 }
 0x209   : > { %s2176_s19 = smov %s2165_s23 }
 0x20a   : > { %s2177_s21 = smov %s2167_s8 }
 0x20b   : > { %s2178_s23 = smov %s2169_s30 }
 0x20f   :  { %783 = vsyncpa [#allocation3], 1 }
 0x210   :  { %785 = vsyncpa [#allocation3 + $0x1], 1 }
 0x211   :  { %786 = vsyncpa [#allocation6], 1 }
 0x212   :  { %788 = vsyncpa [#allocation6 + $0x1], 1 }
 0x213   :  { %789 = vsyncpa [#allocation4], 1 }
 0x214   :  { %791 = vsyncpa [#allocation4 + $0x1], 1 }

</bundles_post_ra>
